<compile_context>
chip_gen: v5e
topology: v5e:2x2
jax: 0.10.0
libtpu: 0.0.40
codegen_flags: <defaults>
</compile_context>

<pallas_src>
import jax
import jax.numpy as jnp
import numpy as np
from jax.experimental import pallas as pl
from jax.experimental.pallas import tpu as pltpu

# ---------------- model config (matches RNNModel.__init__ args) -------------
RNN_TYPE = "LSTM"
BIDIRECTIONAL = True
EMBEDDING_DIM = 16
NUM_EMBEDDINGS = 32
HIDDEN_SIZE = 32
NUM_OUTS = 4
NUM_LAYERS = 1          # dropout only applies between layers -> inactive
DROPOUT = 0.0
IN_LINEAR = 2 * HIDDEN_SIZE if BIDIRECTIONAL else HIDDEN_SIZE
OUT_PAD = 128           # lane-dense output slab (>= NUM_OUTS)
BP = 8                  # sublane-padded batch rows per grid step

B = 2                   # batch (external)
T = 8                   # max sequence length


# ----------------------------- Pallas kernel --------------------------------
def bilstm_fused_kernel(tokf_ref,     # (T*BP, 1)  i32  fwd-time tokens (row t*BP+b), in [0, V)
                        tokb_ref,     # (T*BP, 1)  i32  bwd-time tokens + V, in [V, 2V)
                        len_ref,      # (BP, 1)    i32  (padded rows have len 0)
                        proj_ref,     # (2V, 8H)   f32  merged pre-projected emb table
                                      #                 rows [0,V): fwd gate cols only
                                      #                 rows [V,2V): bwd gate cols only
                                      #                 gate chunks [f,i,o,g], f/i/o pre-scaled 0.5
                        whh_ref,      # (2H, 8H)   f32  block-diag recurrent weights (same layout)
                        wout_ref,     # (2H, OUT_PAD) f32
                        bout_ref,     # (1, OUT_PAD)  f32
                        out_ref):     # (BP, OUT_PAD) f32
    TB = tokf_ref.shape[0]
    V2 = proj_ref.shape[0]           # 2V
    H2 = whh_ref.shape[0]            # 2H
    H = H2 // 2
    BP_ = len_ref.shape[0]
    T_ = TB // BP_                   # static Python int -> loop fully unrolled

    lens = len_ref[...]              # (BP, 1) int32
    whh = whh_ref[...]               # (2H, 8H)

    # ---- embedding gather + input projection + direction merge, all hoisted --
    # One (T*BP, 2V) one-hot, one MXU matmul: row t*BP+b of xg_all already has
    # fwd-time inputs in the fwd gate columns and bwd-time inputs in the bwd
    # gate columns (biases folded in at pack time).
    lane = jax.lax.broadcasted_iota(jnp.int32, (TB, V2), 1)
    onehot = ((lane == tokf_ref[...]) | (lane == tokb_ref[...])).astype(jnp.float32)
    xg_all = jnp.dot(onehot, proj_ref[...],
                     preferred_element_type=jnp.float32)          # (TB, 8H)

    # mask helper for the packed-sequence emulation (hoisted)
    lane_h = jax.lax.broadcasted_iota(jnp.int32, (1, H2), 1)
    is_fwd_half = lane_h < H                                      # (1, 2H)

    # fused carries: h = [h_fwd | h_bwd], c = [c_fwd | c_bwd]  -> (BP, 2H)
    h = jnp.zeros((BP_, H2), jnp.float32)
    c = jnp.zeros((BP_, H2), jnp.float32)

    # ---- fused fwd+bwd recurrence, fully unrolled -----------------------------
    for s in range(T_):
        tr = T_ - 1 - s                                           # bwd time index
        xg = xg_all[s * BP_:(s + 1) * BP_, :]                     # aligned (8, 8H) slab

        # one MXU push per step for BOTH directions
        g = xg + jnp.dot(h, whh, preferred_element_type=jnp.float32)   # (BP, 8H)

        # single full-width tanh; sigmoid gates via 0.5*tanh(x/2)+0.5 (exact,
        # the 0.5 scaling of f/i/o columns was applied at pack time).
        t = jnp.tanh(g)
        st = 0.5 * t + 0.5
        f_g = st[:, 0 * H2:1 * H2]                                # [f_f | f_b]
        i_g = st[:, 1 * H2:2 * H2]                                # [i_f | i_b]
        o_g = st[:, 2 * H2:3 * H2]                                # [o_f | o_b]
        g_g = t[:, 3 * H2:4 * H2]                                 # [g_f | g_b]

        c_new = f_g * c + i_g * g_g
        h_new = o_g * jnp.tanh(c_new)

        # pack_padded_sequence emulation: fwd half valid iff s < len,
        # bwd half valid iff (T-1-s) < len.  Padded batch rows have len 0.
        tvec = jnp.where(is_fwd_half, s, tr)                      # (1, 2H) static ints
        valid = tvec < lens                                       # (BP, 2H)
        h = jnp.where(valid, h_new, h)
        c = jnp.where(valid, c_new, c)

    # final Linear on [h_fwd_final | h_bwd_final]; lane-dense (8, 128) store.
    out_ref[...] = (jnp.dot(h, wout_ref[...], preferred_element_type=jnp.float32)
                    + bout_ref[...])


# ------------------------------ wrapper --------------------------------------
def rnn_model_forward(tokens, seq_len, packed):
    """tokens: (B, T) int32, seq_len: (B,) int32 (sorted descending)."""
    B_in, T_in = tokens.shape
    V = NUM_EMBEDDINGS
    n_chunks = (B_in + BP - 1) // BP
    Bpad = n_chunks * BP

    # pad batch to 8-sublane chunks; padded rows: token 0, len 0 (carries frozen)
    tok = jnp.zeros((Bpad, T_in), jnp.int32).at[:B_in].set(tokens.astype(jnp.int32))
    lens = jnp.zeros((Bpad,), jnp.int32).at[:B_in].set(seq_len.astype(jnp.int32))

    # time-major layout per chunk: row index = t*BP + b_local
    tok3 = tok.reshape(n_chunks, BP, T_in).transpose(0, 2, 1)        # (nc, T, BP)
    tokf = tok3.reshape(n_chunks * T_in * BP, 1)                     # fwd-time tokens
    tokb = (tok3[:, ::-1, :] + V).reshape(n_chunks * T_in * BP, 1)   # bwd-time tokens + V
    lens_col = lens.reshape(n_chunks * BP, 1)

    H = HIDDEN_SIZE
    # weights are grid-invariant: index_map -> (0, 0) keeps them VMEM-resident
    # across all batch chunks (one DMA per call, not per chunk).
    def weight_spec(shape):
        return pl.BlockSpec(shape, lambda i: (0, 0))

    scores_pad = pl.pallas_call(
        bilstm_fused_kernel,
        out_shape=jax.ShapeDtypeStruct((n_chunks * BP, OUT_PAD), jnp.float32),
        grid=(n_chunks,),
        in_specs=[
            pl.BlockSpec((T_in * BP, 1), lambda i: (i, 0)),          # tokf
            pl.BlockSpec((T_in * BP, 1), lambda i: (i, 0)),          # tokb
            pl.BlockSpec((BP, 1), lambda i: (i, 0)),                 # lens
            weight_spec((2 * V, 8 * H)),                             # merged proj table
            weight_spec((2 * H, 8 * H)),                             # whh
            weight_spec((2 * H, OUT_PAD)),                           # wout
            weight_spec((1, OUT_PAD)),                               # bout
        ],
        out_specs=pl.BlockSpec((BP, OUT_PAD), lambda i: (i, 0)),
        compiler_params=pltpu.CompilerParams(
            dimension_semantics=("parallel",)),
    )(tokf, tokb, lens_col, packed["proj"], packed["whh"],
      packed["wout_pad"], packed["bout_pad"])
    return scores_pad[:B_in, :NUM_OUTS]


# ----------------- weight packing (done once, pure param transform) ----------
def pack_params(p):
    """Fold embedding + input projections, fuse directions, reorder gates,
    pre-scale sigmoid-gate columns (single-tanh trick), and merge the
    direction-select into the projection table."""
    H = HIDDEN_SIZE
    V = NUM_EMBEDDINGS

    # PyTorch gate order is [i, f, g, o]; we lay gates out as chunks [f, i, o, g]
    # so f/o share a 64-lane offset with the carries, i/g share one with each other.
    gate_order = (1, 0, 3, 2)   # -> f, i, o, g

    def interleave(wf, wb):
        # (in, 4H) x2  ->  (in, 8H) chunks [f_f,f_b, i_f,i_b, o_f,o_b, g_f,g_b]
        parts = []
        for gid in gate_order:
            parts.append(wf[:, gid * H:(gid + 1) * H])
            parts.append(wb[:, gid * H:(gid + 1) * H])
        return jnp.concatenate(parts, axis=1)

    wih_cat = interleave(p["wih_f"], p["wih_b"])                  # (E, 8H)
    b_cat = interleave(p["b_f"], p["b_b"])                        # (1, 8H)
    proj = p["emb_table"] @ wih_cat + b_cat                       # (V, 8H)

    zH = jnp.zeros((H, 4 * H), jnp.float32)
    whh_top = interleave(p["whh_f"], zH)                          # h_fwd -> fwd gate cols
    whh_bot = interleave(zH, p["whh_b"])                          # h_bwd -> bwd gate cols
    whh = jnp.concatenate([whh_top, whh_bot], axis=0)             # (2H, 8H) block-diag

    # single-tanh trick: sigmoid(x) = 0.5*tanh(x/2)+0.5 -> halve the f/i/o
    # gate columns (first 6H) of both proj (bias folded in) and whh; exact.
    gate_scale = jnp.concatenate([jnp.full((1, 6 * H), 0.5, jnp.float32),
                                  jnp.ones((1, 2 * H), jnp.float32)], axis=1)
    proj = proj * gate_scale
    whh = whh * gate_scale

    # direction merge hoisted into the table: rows [0,V) feed only fwd gate
    # columns, rows [V,2V) feed only bwd gate columns.
    col = np.arange(8 * H)
    fwd_mask = jnp.asarray(((col // H) % 2) == 0, jnp.float32).reshape(1, 8 * H)
    proj_merged = jnp.concatenate([proj * fwd_mask,
                                   proj * (1.0 - fwd_mask)], axis=0)   # (2V, 8H)

    wout_pad = jnp.zeros((2 * H, OUT_PAD), jnp.float32).at[:, :NUM_OUTS].set(p["wout"])
    bout_pad = jnp.zeros((1, OUT_PAD), jnp.float32).at[:, :NUM_OUTS].set(p["bout"])
    return dict(proj=proj_merged, whh=whh, wout_pad=wout_pad, bout_pad=bout_pad)


# ------------------------ deterministic parameter init ----------------------
def init_params(key):
    ks = jax.random.split(key, 12)
    H, E = HIDDEN_SIZE, EMBEDDING_DIM
    k_lstm = 1.0 / np.sqrt(H)
    k_lin = 1.0 / np.sqrt(IN_LINEAR)

    def u(k, shape, bound):
        return jax.random.uniform(k, shape, jnp.float32, -bound, bound)

    emb_table = jax.random.normal(ks[0], (NUM_EMBEDDINGS, E), jnp.float32)
    emb_table = emb_table.at[0].set(0.0)                          # padding_idx=0

    # PyTorch LSTM params (gate order i, f, g, o), pre-transposed to (in, out).
    wih_f = u(ks[1], (4 * H, E), k_lstm).T                        # (E, 4H)
    whh_f = u(ks[2], (4 * H, H), k_lstm).T                        # (H, 4H)
    b_f = (u(ks[3], (4 * H,), k_lstm) + u(ks[4], (4 * H,), k_lstm)).reshape(1, 4 * H)
    wih_b = u(ks[5], (4 * H, E), k_lstm).T
    whh_b = u(ks[6], (4 * H, H), k_lstm).T
    b_b = (u(ks[7], (4 * H,), k_lstm) + u(ks[8], (4 * H,), k_lstm)).reshape(1, 4 * H)

    wout = u(ks[9], (NUM_OUTS, IN_LINEAR), k_lin).T               # (2H, O)
    bout = u(ks[10], (NUM_OUTS,), k_lin).reshape(1, NUM_OUTS)

    return dict(emb_table=emb_table,
                wih_f=wih_f, whh_f=whh_f, b_f=b_f,
                wih_b=wih_b, whh_b=whh_b, b_b=b_b,
                wout=wout, bout=bout)


# ----------------------------- pure-JAX reference ----------------------------
def reference_forward(tokens, seq_len, p):
    emb = p["emb_table"][tokens]                                  # (B, T, E)
    H = HIDDEN_SIZE

    def cell(x_t, h, c, wih, whh, b):
        g = x_t @ wih + h @ whh + b
        i = jax.nn.sigmoid(g[:, 0 * H:1 * H])
        f = jax.nn.sigmoid(g[:, 1 * H:2 * H])
        gg = jnp.tanh(g[:, 2 * H:3 * H])
        o = jax.nn.sigmoid(g[:, 3 * H:4 * H])
        c_new = f * c + i * gg
        return o * jnp.tanh(c_new), c_new

    Bn = tokens.shape[0]
    lens = seq_len.reshape(Bn, 1)
    h = c = jnp.zeros((Bn, H), jnp.float32)
    for t in range(T):
        hn, cn = cell(emb[:, t, :], h, c, p["wih_f"], p["whh_f"], p["b_f"])
        m = t < lens
        h = jnp.where(m, hn, h); c = jnp.where(m, cn, c)
    h_f = h
    h = c = jnp.zeros((Bn, H), jnp.float32)
    for t in range(T - 1, -1, -1):
        hn, cn = cell(emb[:, t, :], h, c, p["wih_b"], p["whh_b"], p["b_b"])
        m = t < lens
        h = jnp.where(m, hn, h); c = jnp.where(m, cn, c)
    h_b = h
    return jnp.concatenate([h_f, h_b], -1) @ p["wout"] + p["bout"]


if __name__ == "__main__":
    key = jax.random.PRNGKey(0)
    kp, kt = jax.random.split(key)
    params = init_params(kp)
    packed = pack_params(params)         # weight-only transform, done once

    # sequences sorted by decreasing length (pack_padded_sequence default)
    seq_len = jnp.array([8, 5], dtype=jnp.int32)
    tokens = jax.random.randint(kt, (B, T), 1, NUM_EMBEDDINGS, dtype=jnp.int32)
    pad_mask = jnp.arange(T)[None, :] < seq_len[:, None]
    tokens = jnp.where(pad_mask, tokens, 0)                       # padding_idx = 0

    fwd = jax.jit(rnn_model_forward)
    scores = jax.block_until_ready(fwd(tokens, seq_len, packed))
    ref = reference_forward(tokens, seq_len, params)

    assert scores.shape == (B, NUM_OUTS)
    np.testing.assert_allclose(np.asarray(scores), np.asarray(ref),
                               rtol=1e-4, atol=1e-5)
    print("KERNEL_OK")
</pallas_src>

<mosaic_0001>
module attributes {stable_mosaic.version = 11 : i64} {
  func.func @bilstm_fused_kernel(%arg0: i32, %arg1: memref<64x1xi32, #tpu.memory_space<vmem>>, %arg2: memref<64x1xi32, #tpu.memory_space<vmem>>, %arg3: memref<8x1xi32, #tpu.memory_space<vmem>>, %arg4: memref<64x256xf32, #tpu.memory_space<vmem>>, %arg5: memref<64x256xf32, #tpu.memory_space<vmem>>, %arg6: memref<64x128xf32, #tpu.memory_space<vmem>>, %arg7: memref<1x128xf32, #tpu.memory_space<vmem>>, %arg8: memref<8x128xf32, #tpu.memory_space<vmem>>) attributes {dimension_semantics = [#tpu.dimension_semantics<parallel>], iteration_bounds = array<i64: 1>, scalar_prefetch = 0 : i64, scratch_operands = 0 : i64, tpu.core_type = #tpu.core_type<tc>, window_params = [{transform_indices = @transform_0, window_bounds = array<i64: 64, 1>}, {transform_indices = @transform_1, window_bounds = array<i64: 64, 1>}, {transform_indices = @transform_2, window_bounds = array<i64: 8, 1>}, {pipeline_mode = #tpu.pipeline_mode<synchronous>, transform_indices = @transform_3, window_bounds = array<i64: 64, 256>}, {pipeline_mode = #tpu.pipeline_mode<synchronous>, transform_indices = @transform_4, window_bounds = array<i64: 64, 256>}, {pipeline_mode = #tpu.pipeline_mode<synchronous>, transform_indices = @transform_5, window_bounds = array<i64: 64, 128>}, {pipeline_mode = #tpu.pipeline_mode<synchronous>, transform_indices = @transform_6, window_bounds = array<i64: 1, 128>}, {transform_indices = @transform_7, window_bounds = array<i64: 8, 128>}]} {
    %c0 = arith.constant 0 : index
    %c0_0 = arith.constant 0 : index
    %0 = vector.load %arg3[%c0, %c0_0] : memref<8x1xi32, #tpu.memory_space<vmem>>, vector<8x1xi32>
    %c0_1 = arith.constant 0 : index
    %c0_2 = arith.constant 0 : index
    %1 = vector.load %arg5[%c0_1, %c0_2] : memref<64x256xf32, #tpu.memory_space<vmem>>, vector<64x256xf32>
    %2 = tpu.iota {dimensions = array<i32: 1>} : vector<64x64xi32>
    %c0_3 = arith.constant 0 : index
    %c0_4 = arith.constant 0 : index
    %3 = vector.load %arg1[%c0_3, %c0_4] : memref<64x1xi32, #tpu.memory_space<vmem>>, vector<64x1xi32>
    %4 = vector.broadcast %3 : vector<64x1xi32> to vector<64x64xi32>
    %5 = arith.cmpi eq, %2, %4 : vector<64x64xi32>
    %c0_5 = arith.constant 0 : index
    %c0_6 = arith.constant 0 : index
    %6 = vector.load %arg2[%c0_5, %c0_6] : memref<64x1xi32, #tpu.memory_space<vmem>>, vector<64x1xi32>
    %7 = vector.broadcast %6 : vector<64x1xi32> to vector<64x64xi32>
    %8 = arith.cmpi eq, %2, %7 : vector<64x64xi32>
    %9 = arith.ori %5, %8 : vector<64x64xi1>
    %10 = arith.extui %9 : vector<64x64xi1> to vector<64x64xi32>
    %11 = arith.sitofp %10 : vector<64x64xi32> to vector<64x64xf32>
    %c0_7 = arith.constant 0 : index
    %c0_8 = arith.constant 0 : index
    %12 = vector.load %arg4[%c0_7, %c0_8] : memref<64x256xf32, #tpu.memory_space<vmem>>, vector<64x256xf32>
    %cst = arith.constant dense<0.000000e+00> : vector<64x256xf32>
    %13 = tpu.matmul %11, %12, %cst {dimension_numbers = #tpu.dot_dimension_numbers<[1], [0], [0], [1], [0, 0, 1, 1], [], []>} : vector<64x64xf32>, vector<64x256xf32>, vector<64x256xf32> -> vector<64x256xf32>
    %14 = tpu.iota {dimensions = array<i32: 1>} : vector<1x64xi32>
    %c32_i32 = arith.constant 32 : i32
    %15 = vector.broadcast %c32_i32 : i32 to vector<1x64xi32>
    %16 = arith.cmpi slt, %14, %15 : vector<1x64xi32>
    %cst_9 = arith.constant 0.000000e+00 : f32
    %17 = vector.broadcast %cst_9 : f32 to vector<8x64xf32>
    %cst_10 = arith.constant 0.000000e+00 : f32
    %18 = vector.broadcast %cst_10 : f32 to vector<8x64xf32>
    %19 = vector.extract_strided_slice %13 {offsets = [0, 0], sizes = [8, 256], strides = [1, 1]} : vector<64x256xf32> to vector<8x256xf32>
    %cst_11 = arith.constant dense<0.000000e+00> : vector<8x256xf32>
    %20 = tpu.matmul %17, %1, %cst_11 {dimension_numbers = #tpu.dot_dimension_numbers<[1], [0], [0], [1], [0, 0, 1, 1], [], []>} : vector<8x64xf32>, vector<64x256xf32>, vector<8x256xf32> -> vector<8x256xf32>
    %21 = arith.addf %19, %20 : vector<8x256xf32>
    %22 = math.tanh %21 : vector<8x256xf32>
    %cst_12 = arith.constant 5.000000e-01 : f32
    %23 = vector.broadcast %cst_12 : f32 to vector<8x256xf32>
    %24 = arith.mulf %23, %22 : vector<8x256xf32>
    %cst_13 = arith.constant 5.000000e-01 : f32
    %25 = vector.broadcast %cst_13 : f32 to vector<8x256xf32>
    %26 = arith.addf %24, %25 : vector<8x256xf32>
    %27 = vector.extract_strided_slice %26 {offsets = [0, 0], sizes = [8, 64], strides = [1, 1]} : vector<8x256xf32> to vector<8x64xf32>
    %28 = vector.extract_strided_slice %26 {offsets = [0, 64], sizes = [8, 64], strides = [1, 1]} : vector<8x256xf32> to vector<8x64xf32>
    %29 = vector.extract_strided_slice %26 {offsets = [0, 128], sizes = [8, 64], strides = [1, 1]} : vector<8x256xf32> to vector<8x64xf32>
    %30 = vector.extract_strided_slice %22 {offsets = [0, 192], sizes = [8, 64], strides = [1, 1]} : vector<8x256xf32> to vector<8x64xf32>
    %31 = arith.mulf %27, %18 : vector<8x64xf32>
    %32 = arith.mulf %28, %30 : vector<8x64xf32>
    %33 = arith.addf %31, %32 : vector<8x64xf32>
    %34 = math.tanh %33 : vector<8x64xf32>
    %35 = arith.mulf %29, %34 : vector<8x64xf32>
    %c0_i32 = arith.constant 0 : i32
    %c7_i32 = arith.constant 7 : i32
    %36 = vector.broadcast %c0_i32 : i32 to vector<1x64xi32>
    %37 = vector.broadcast %c7_i32 : i32 to vector<1x64xi32>
    %38 = arith.select %16, %36, %37 : vector<1x64xi1>, vector<1x64xi32>
    %39 = vector.broadcast %38 : vector<1x64xi32> to vector<8x64xi32>
    %40 = vector.broadcast %0 : vector<8x1xi32> to vector<8x64xi32>
    %41 = arith.cmpi slt, %39, %40 : vector<8x64xi32>
    %42 = arith.select %41, %35, %17 : vector<8x64xi1>, vector<8x64xf32>
    %43 = arith.select %41, %33, %18 : vector<8x64xi1>, vector<8x64xf32>
    %44 = vector.extract_strided_slice %13 {offsets = [8, 0], sizes = [8, 256], strides = [1, 1]} : vector<64x256xf32> to vector<8x256xf32>
    %cst_14 = arith.constant dense<0.000000e+00> : vector<8x256xf32>
    %45 = tpu.matmul %42, %1, %cst_14 {dimension_numbers = #tpu.dot_dimension_numbers<[1], [0], [0], [1], [0, 0, 1, 1], [], []>} : vector<8x64xf32>, vector<64x256xf32>, vector<8x256xf32> -> vector<8x256xf32>
    %46 = arith.addf %44, %45 : vector<8x256xf32>
    %47 = math.tanh %46 : vector<8x256xf32>
    %cst_15 = arith.constant 5.000000e-01 : f32
    %48 = vector.broadcast %cst_15 : f32 to vector<8x256xf32>
    %49 = arith.mulf %48, %47 : vector<8x256xf32>
    %cst_16 = arith.constant 5.000000e-01 : f32
    %50 = vector.broadcast %cst_16 : f32 to vector<8x256xf32>
    %51 = arith.addf %49, %50 : vector<8x256xf32>
    %52 = vector.extract_strided_slice %51 {offsets = [0, 0], sizes = [8, 64], strides = [1, 1]} : vector<8x256xf32> to vector<8x64xf32>
    %53 = vector.extract_strided_slice %51 {offsets = [0, 64], sizes = [8, 64], strides = [1, 1]} : vector<8x256xf32> to vector<8x64xf32>
    %54 = vector.extract_strided_slice %51 {offsets = [0, 128], sizes = [8, 64], strides = [1, 1]} : vector<8x256xf32> to vector<8x64xf32>
    %55 = vector.extract_strided_slice %47 {offsets = [0, 192], sizes = [8, 64], strides = [1, 1]} : vector<8x256xf32> to vector<8x64xf32>
    %56 = arith.mulf %52, %43 : vector<8x64xf32>
    %57 = arith.mulf %53, %55 : vector<8x64xf32>
    %58 = arith.addf %56, %57 : vector<8x64xf32>
    %59 = math.tanh %58 : vector<8x64xf32>
    %60 = arith.mulf %54, %59 : vector<8x64xf32>
    %c1_i32 = arith.constant 1 : i32
    %c6_i32 = arith.constant 6 : i32
    %61 = vector.broadcast %c1_i32 : i32 to vector<1x64xi32>
    %62 = vector.broadcast %c6_i32 : i32 to vector<1x64xi32>
    %63 = arith.select %16, %61, %62 : vector<1x64xi1>, vector<1x64xi32>
    %64 = vector.broadcast %63 : vector<1x64xi32> to vector<8x64xi32>
    %65 = vector.broadcast %0 : vector<8x1xi32> to vector<8x64xi32>
    %66 = arith.cmpi slt, %64, %65 : vector<8x64xi32>
    %67 = arith.select %66, %60, %42 : vector<8x64xi1>, vector<8x64xf32>
    %68 = arith.select %66, %58, %43 : vector<8x64xi1>, vector<8x64xf32>
    %69 = vector.extract_strided_slice %13 {offsets = [16, 0], sizes = [8, 256], strides = [1, 1]} : vector<64x256xf32> to vector<8x256xf32>
    %cst_17 = arith.constant dense<0.000000e+00> : vector<8x256xf32>
    %70 = tpu.matmul %67, %1, %cst_17 {dimension_numbers = #tpu.dot_dimension_numbers<[1], [0], [0], [1], [0, 0, 1, 1], [], []>} : vector<8x64xf32>, vector<64x256xf32>, vector<8x256xf32> -> vector<8x256xf32>
    %71 = arith.addf %69, %70 : vector<8x256xf32>
    %72 = math.tanh %71 : vector<8x256xf32>
    %cst_18 = arith.constant 5.000000e-01 : f32
    %73 = vector.broadcast %cst_18 : f32 to vector<8x256xf32>
    %74 = arith.mulf %73, %72 : vector<8x256xf32>
    %cst_19 = arith.constant 5.000000e-01 : f32
    %75 = vector.broadcast %cst_19 : f32 to vector<8x256xf32>
    %76 = arith.addf %74, %75 : vector<8x256xf32>
    %77 = vector.extract_strided_slice %76 {offsets = [0, 0], sizes = [8, 64], strides = [1, 1]} : vector<8x256xf32> to vector<8x64xf32>
    %78 = vector.extract_strided_slice %76 {offsets = [0, 64], sizes = [8, 64], strides = [1, 1]} : vector<8x256xf32> to vector<8x64xf32>
    %79 = vector.extract_strided_slice %76 {offsets = [0, 128], sizes = [8, 64], strides = [1, 1]} : vector<8x256xf32> to vector<8x64xf32>
    %80 = vector.extract_strided_slice %72 {offsets = [0, 192], sizes = [8, 64], strides = [1, 1]} : vector<8x256xf32> to vector<8x64xf32>
    %81 = arith.mulf %77, %68 : vector<8x64xf32>
    %82 = arith.mulf %78, %80 : vector<8x64xf32>
    %83 = arith.addf %81, %82 : vector<8x64xf32>
    %84 = math.tanh %83 : vector<8x64xf32>
    %85 = arith.mulf %79, %84 : vector<8x64xf32>
    %c2_i32 = arith.constant 2 : i32
    %c5_i32 = arith.constant 5 : i32
    %86 = vector.broadcast %c2_i32 : i32 to vector<1x64xi32>
    %87 = vector.broadcast %c5_i32 : i32 to vector<1x64xi32>
    %88 = arith.select %16, %86, %87 : vector<1x64xi1>, vector<1x64xi32>
    %89 = vector.broadcast %88 : vector<1x64xi32> to vector<8x64xi32>
    %90 = vector.broadcast %0 : vector<8x1xi32> to vector<8x64xi32>
    %91 = arith.cmpi slt, %89, %90 : vector<8x64xi32>
    %92 = arith.select %91, %85, %67 : vector<8x64xi1>, vector<8x64xf32>
    %93 = arith.select %91, %83, %68 : vector<8x64xi1>, vector<8x64xf32>
    %94 = vector.extract_strided_slice %13 {offsets = [24, 0], sizes = [8, 256], strides = [1, 1]} : vector<64x256xf32> to vector<8x256xf32>
    %cst_20 = arith.constant dense<0.000000e+00> : vector<8x256xf32>
    %95 = tpu.matmul %92, %1, %cst_20 {dimension_numbers = #tpu.dot_dimension_numbers<[1], [0], [0], [1], [0, 0, 1, 1], [], []>} : vector<8x64xf32>, vector<64x256xf32>, vector<8x256xf32> -> vector<8x256xf32>
    %96 = arith.addf %94, %95 : vector<8x256xf32>
    %97 = math.tanh %96 : vector<8x256xf32>
    %cst_21 = arith.constant 5.000000e-01 : f32
    %98 = vector.broadcast %cst_21 : f32 to vector<8x256xf32>
    %99 = arith.mulf %98, %97 : vector<8x256xf32>
    %cst_22 = arith.constant 5.000000e-01 : f32
    %100 = vector.broadcast %cst_22 : f32 to vector<8x256xf32>
    %101 = arith.addf %99, %100 : vector<8x256xf32>
    %102 = vector.extract_strided_slice %101 {offsets = [0, 0], sizes = [8, 64], strides = [1, 1]} : vector<8x256xf32> to vector<8x64xf32>
    %103 = vector.extract_strided_slice %101 {offsets = [0, 64], sizes = [8, 64], strides = [1, 1]} : vector<8x256xf32> to vector<8x64xf32>
    %104 = vector.extract_strided_slice %101 {offsets = [0, 128], sizes = [8, 64], strides = [1, 1]} : vector<8x256xf32> to vector<8x64xf32>
    %105 = vector.extract_strided_slice %97 {offsets = [0, 192], sizes = [8, 64], strides = [1, 1]} : vector<8x256xf32> to vector<8x64xf32>
    %106 = arith.mulf %102, %93 : vector<8x64xf32>
    %107 = arith.mulf %103, %105 : vector<8x64xf32>
    %108 = arith.addf %106, %107 : vector<8x64xf32>
    %109 = math.tanh %108 : vector<8x64xf32>
    %110 = arith.mulf %104, %109 : vector<8x64xf32>
    %c3_i32 = arith.constant 3 : i32
    %c4_i32 = arith.constant 4 : i32
    %111 = vector.broadcast %c3_i32 : i32 to vector<1x64xi32>
    %112 = vector.broadcast %c4_i32 : i32 to vector<1x64xi32>
    %113 = arith.select %16, %111, %112 : vector<1x64xi1>, vector<1x64xi32>
    %114 = vector.broadcast %113 : vector<1x64xi32> to vector<8x64xi32>
    %115 = vector.broadcast %0 : vector<8x1xi32> to vector<8x64xi32>
    %116 = arith.cmpi slt, %114, %115 : vector<8x64xi32>
    %117 = arith.select %116, %110, %92 : vector<8x64xi1>, vector<8x64xf32>
    %118 = arith.select %116, %108, %93 : vector<8x64xi1>, vector<8x64xf32>
    %119 = vector.extract_strided_slice %13 {offsets = [32, 0], sizes = [8, 256], strides = [1, 1]} : vector<64x256xf32> to vector<8x256xf32>
    %cst_23 = arith.constant dense<0.000000e+00> : vector<8x256xf32>
    %120 = tpu.matmul %117, %1, %cst_23 {dimension_numbers = #tpu.dot_dimension_numbers<[1], [0], [0], [1], [0, 0, 1, 1], [], []>} : vector<8x64xf32>, vector<64x256xf32>, vector<8x256xf32> -> vector<8x256xf32>
    %121 = arith.addf %119, %120 : vector<8x256xf32>
    %122 = math.tanh %121 : vector<8x256xf32>
    %cst_24 = arith.constant 5.000000e-01 : f32
    %123 = vector.broadcast %cst_24 : f32 to vector<8x256xf32>
    %124 = arith.mulf %123, %122 : vector<8x256xf32>
    %cst_25 = arith.constant 5.000000e-01 : f32
    %125 = vector.broadcast %cst_25 : f32 to vector<8x256xf32>
    %126 = arith.addf %124, %125 : vector<8x256xf32>
    %127 = vector.extract_strided_slice %126 {offsets = [0, 0], sizes = [8, 64], strides = [1, 1]} : vector<8x256xf32> to vector<8x64xf32>
    %128 = vector.extract_strided_slice %126 {offsets = [0, 64], sizes = [8, 64], strides = [1, 1]} : vector<8x256xf32> to vector<8x64xf32>
    %129 = vector.extract_strided_slice %126 {offsets = [0, 128], sizes = [8, 64], strides = [1, 1]} : vector<8x256xf32> to vector<8x64xf32>
    %130 = vector.extract_strided_slice %122 {offsets = [0, 192], sizes = [8, 64], strides = [1, 1]} : vector<8x256xf32> to vector<8x64xf32>
    %131 = arith.mulf %127, %118 : vector<8x64xf32>
    %132 = arith.mulf %128, %130 : vector<8x64xf32>
    %133 = arith.addf %131, %132 : vector<8x64xf32>
    %134 = math.tanh %133 : vector<8x64xf32>
    %135 = arith.mulf %129, %134 : vector<8x64xf32>
    %c4_i32_26 = arith.constant 4 : i32
    %c3_i32_27 = arith.constant 3 : i32
    %136 = vector.broadcast %c4_i32_26 : i32 to vector<1x64xi32>
    %137 = vector.broadcast %c3_i32_27 : i32 to vector<1x64xi32>
    %138 = arith.select %16, %136, %137 : vector<1x64xi1>, vector<1x64xi32>
    %139 = vector.broadcast %138 : vector<1x64xi32> to vector<8x64xi32>
    %140 = vector.broadcast %0 : vector<8x1xi32> to vector<8x64xi32>
    %141 = arith.cmpi slt, %139, %140 : vector<8x64xi32>
    %142 = arith.select %141, %135, %117 : vector<8x64xi1>, vector<8x64xf32>
    %143 = arith.select %141, %133, %118 : vector<8x64xi1>, vector<8x64xf32>
    %144 = vector.extract_strided_slice %13 {offsets = [40, 0], sizes = [8, 256], strides = [1, 1]} : vector<64x256xf32> to vector<8x256xf32>
    %cst_28 = arith.constant dense<0.000000e+00> : vector<8x256xf32>
    %145 = tpu.matmul %142, %1, %cst_28 {dimension_numbers = #tpu.dot_dimension_numbers<[1], [0], [0], [1], [0, 0, 1, 1], [], []>} : vector<8x64xf32>, vector<64x256xf32>, vector<8x256xf32> -> vector<8x256xf32>
    %146 = arith.addf %144, %145 : vector<8x256xf32>
    %147 = math.tanh %146 : vector<8x256xf32>
    %cst_29 = arith.constant 5.000000e-01 : f32
    %148 = vector.broadcast %cst_29 : f32 to vector<8x256xf32>
    %149 = arith.mulf %148, %147 : vector<8x256xf32>
    %cst_30 = arith.constant 5.000000e-01 : f32
    %150 = vector.broadcast %cst_30 : f32 to vector<8x256xf32>
    %151 = arith.addf %149, %150 : vector<8x256xf32>
    %152 = vector.extract_strided_slice %151 {offsets = [0, 0], sizes = [8, 64], strides = [1, 1]} : vector<8x256xf32> to vector<8x64xf32>
    %153 = vector.extract_strided_slice %151 {offsets = [0, 64], sizes = [8, 64], strides = [1, 1]} : vector<8x256xf32> to vector<8x64xf32>
    %154 = vector.extract_strided_slice %151 {offsets = [0, 128], sizes = [8, 64], strides = [1, 1]} : vector<8x256xf32> to vector<8x64xf32>
    %155 = vector.extract_strided_slice %147 {offsets = [0, 192], sizes = [8, 64], strides = [1, 1]} : vector<8x256xf32> to vector<8x64xf32>
    %156 = arith.mulf %152, %143 : vector<8x64xf32>
    %157 = arith.mulf %153, %155 : vector<8x64xf32>
    %158 = arith.addf %156, %157 : vector<8x64xf32>
    %159 = math.tanh %158 : vector<8x64xf32>
    %160 = arith.mulf %154, %159 : vector<8x64xf32>
    %c5_i32_31 = arith.constant 5 : i32
    %c2_i32_32 = arith.constant 2 : i32
    %161 = vector.broadcast %c5_i32_31 : i32 to vector<1x64xi32>
    %162 = vector.broadcast %c2_i32_32 : i32 to vector<1x64xi32>
    %163 = arith.select %16, %161, %162 : vector<1x64xi1>, vector<1x64xi32>
    %164 = vector.broadcast %163 : vector<1x64xi32> to vector<8x64xi32>
    %165 = vector.broadcast %0 : vector<8x1xi32> to vector<8x64xi32>
    %166 = arith.cmpi slt, %164, %165 : vector<8x64xi32>
    %167 = arith.select %166, %160, %142 : vector<8x64xi1>, vector<8x64xf32>
    %168 = arith.select %166, %158, %143 : vector<8x64xi1>, vector<8x64xf32>
    %169 = vector.extract_strided_slice %13 {offsets = [48, 0], sizes = [8, 256], strides = [1, 1]} : vector<64x256xf32> to vector<8x256xf32>
    %cst_33 = arith.constant dense<0.000000e+00> : vector<8x256xf32>
    %170 = tpu.matmul %167, %1, %cst_33 {dimension_numbers = #tpu.dot_dimension_numbers<[1], [0], [0], [1], [0, 0, 1, 1], [], []>} : vector<8x64xf32>, vector<64x256xf32>, vector<8x256xf32> -> vector<8x256xf32>
    %171 = arith.addf %169, %170 : vector<8x256xf32>
    %172 = math.tanh %171 : vector<8x256xf32>
    %cst_34 = arith.constant 5.000000e-01 : f32
    %173 = vector.broadcast %cst_34 : f32 to vector<8x256xf32>
    %174 = arith.mulf %173, %172 : vector<8x256xf32>
    %cst_35 = arith.constant 5.000000e-01 : f32
    %175 = vector.broadcast %cst_35 : f32 to vector<8x256xf32>
    %176 = arith.addf %174, %175 : vector<8x256xf32>
    %177 = vector.extract_strided_slice %176 {offsets = [0, 0], sizes = [8, 64], strides = [1, 1]} : vector<8x256xf32> to vector<8x64xf32>
    %178 = vector.extract_strided_slice %176 {offsets = [0, 64], sizes = [8, 64], strides = [1, 1]} : vector<8x256xf32> to vector<8x64xf32>
    %179 = vector.extract_strided_slice %176 {offsets = [0, 128], sizes = [8, 64], strides = [1, 1]} : vector<8x256xf32> to vector<8x64xf32>
    %180 = vector.extract_strided_slice %172 {offsets = [0, 192], sizes = [8, 64], strides = [1, 1]} : vector<8x256xf32> to vector<8x64xf32>
    %181 = arith.mulf %177, %168 : vector<8x64xf32>
    %182 = arith.mulf %178, %180 : vector<8x64xf32>
    %183 = arith.addf %181, %182 : vector<8x64xf32>
    %184 = math.tanh %183 : vector<8x64xf32>
    %185 = arith.mulf %179, %184 : vector<8x64xf32>
    %c6_i32_36 = arith.constant 6 : i32
    %c1_i32_37 = arith.constant 1 : i32
    %186 = vector.broadcast %c6_i32_36 : i32 to vector<1x64xi32>
    %187 = vector.broadcast %c1_i32_37 : i32 to vector<1x64xi32>
    %188 = arith.select %16, %186, %187 : vector<1x64xi1>, vector<1x64xi32>
    %189 = vector.broadcast %188 : vector<1x64xi32> to vector<8x64xi32>
    %190 = vector.broadcast %0 : vector<8x1xi32> to vector<8x64xi32>
    %191 = arith.cmpi slt, %189, %190 : vector<8x64xi32>
    %192 = arith.select %191, %185, %167 : vector<8x64xi1>, vector<8x64xf32>
    %193 = arith.select %191, %183, %168 : vector<8x64xi1>, vector<8x64xf32>
    %194 = vector.extract_strided_slice %13 {offsets = [56, 0], sizes = [8, 256], strides = [1, 1]} : vector<64x256xf32> to vector<8x256xf32>
    %cst_38 = arith.constant dense<0.000000e+00> : vector<8x256xf32>
    %195 = tpu.matmul %192, %1, %cst_38 {dimension_numbers = #tpu.dot_dimension_numbers<[1], [0], [0], [1], [0, 0, 1, 1], [], []>} : vector<8x64xf32>, vector<64x256xf32>, vector<8x256xf32> -> vector<8x256xf32>
    %196 = arith.addf %194, %195 : vector<8x256xf32>
    %197 = math.tanh %196 : vector<8x256xf32>
    %cst_39 = arith.constant 5.000000e-01 : f32
    %198 = vector.broadcast %cst_39 : f32 to vector<8x256xf32>
    %199 = arith.mulf %198, %197 : vector<8x256xf32>
    %cst_40 = arith.constant 5.000000e-01 : f32
    %200 = vector.broadcast %cst_40 : f32 to vector<8x256xf32>
    %201 = arith.addf %199, %200 : vector<8x256xf32>
    %202 = vector.extract_strided_slice %201 {offsets = [0, 0], sizes = [8, 64], strides = [1, 1]} : vector<8x256xf32> to vector<8x64xf32>
    %203 = vector.extract_strided_slice %201 {offsets = [0, 64], sizes = [8, 64], strides = [1, 1]} : vector<8x256xf32> to vector<8x64xf32>
    %204 = vector.extract_strided_slice %201 {offsets = [0, 128], sizes = [8, 64], strides = [1, 1]} : vector<8x256xf32> to vector<8x64xf32>
    %205 = vector.extract_strided_slice %197 {offsets = [0, 192], sizes = [8, 64], strides = [1, 1]} : vector<8x256xf32> to vector<8x64xf32>
    %206 = arith.mulf %202, %193 : vector<8x64xf32>
    %207 = arith.mulf %203, %205 : vector<8x64xf32>
    %208 = arith.addf %206, %207 : vector<8x64xf32>
    %209 = math.tanh %208 : vector<8x64xf32>
    %210 = arith.mulf %204, %209 : vector<8x64xf32>
    %c7_i32_41 = arith.constant 7 : i32
    %c0_i32_42 = arith.constant 0 : i32
    %211 = vector.broadcast %c7_i32_41 : i32 to vector<1x64xi32>
    %212 = vector.broadcast %c0_i32_42 : i32 to vector<1x64xi32>
    %213 = arith.select %16, %211, %212 : vector<1x64xi1>, vector<1x64xi32>
    %214 = vector.broadcast %213 : vector<1x64xi32> to vector<8x64xi32>
    %215 = vector.broadcast %0 : vector<8x1xi32> to vector<8x64xi32>
    %216 = arith.cmpi slt, %214, %215 : vector<8x64xi32>
    %217 = arith.select %216, %210, %192 : vector<8x64xi1>, vector<8x64xf32>
    %c0_43 = arith.constant 0 : index
    %c0_44 = arith.constant 0 : index
    %218 = vector.load %arg6[%c0_43, %c0_44] : memref<64x128xf32, #tpu.memory_space<vmem>>, vector<64x128xf32>
    %cst_45 = arith.constant dense<0.000000e+00> : vector<8x128xf32>
    %219 = tpu.matmul %217, %218, %cst_45 {dimension_numbers = #tpu.dot_dimension_numbers<[1], [0], [0], [1], [0, 0, 1, 1], [], []>} : vector<8x64xf32>, vector<64x128xf32>, vector<8x128xf32> -> vector<8x128xf32>
    %c0_46 = arith.constant 0 : index
    %c0_47 = arith.constant 0 : index
    %220 = vector.load %arg7[%c0_46, %c0_47] : memref<1x128xf32, #tpu.memory_space<vmem>>, vector<1x128xf32>
    %221 = vector.broadcast %220 : vector<1x128xf32> to vector<8x128xf32>
    %222 = arith.addf %219, %221 : vector<8x128xf32>
    %c0_48 = arith.constant 0 : index
    %c0_49 = arith.constant 0 : index
    %223 = vector.load %arg8[%c0_48, %c0_49] : memref<8x128xf32, #tpu.memory_space<vmem>>, vector<8x128xf32>
    tpu.vector_store %arg8[%c0_48, %c0_49], %222 {strides = array<i32>} : memref<8x128xf32, #tpu.memory_space<vmem>>, vector<8x128xf32>,
    return
  }
  func.func @transform_0(%arg0: i32) -> (i32, i32) {
    %c0_i32 = arith.constant 0 : i32
    %c0_i32_0 = arith.constant 0 : i32
    return %arg0, %c0_i32 : i32, i32
  }
  func.func @transform_1(%arg0: i32) -> (i32, i32) {
    %c0_i32 = arith.constant 0 : i32
    %c0_i32_0 = arith.constant 0 : i32
    return %arg0, %c0_i32 : i32, i32
  }
  func.func @transform_2(%arg0: i32) -> (i32, i32) {
    %c0_i32 = arith.constant 0 : i32
    %c0_i32_0 = arith.constant 0 : i32
    return %arg0, %c0_i32 : i32, i32
  }
  func.func @transform_3(%arg0: i32) -> (i32, i32) {
    %c0_i32 = arith.constant 0 : i32
    %c0_i32_0 = arith.constant 0 : i32
    %c0_i32_1 = arith.constant 0 : i32
    return %c0_i32, %c0_i32_0 : i32, i32
  }
  func.func @transform_4(%arg0: i32) -> (i32, i32) {
    %c0_i32 = arith.constant 0 : i32
    %c0_i32_0 = arith.constant 0 : i32
    %c0_i32_1 = arith.constant 0 : i32
    return %c0_i32, %c0_i32_0 : i32, i32
  }
  func.func @transform_5(%arg0: i32) -> (i32, i32) {
    %c0_i32 = arith.constant 0 : i32
    %c0_i32_0 = arith.constant 0 : i32
    %c0_i32_1 = arith.constant 0 : i32
    return %c0_i32, %c0_i32_0 : i32, i32
  }
  func.func @transform_6(%arg0: i32) -> (i32, i32) {
    %c0_i32 = arith.constant 0 : i32
    %c0_i32_0 = arith.constant 0 : i32
    %c0_i32_1 = arith.constant 0 : i32
    return %c0_i32, %c0_i32_0 : i32, i32
  }
  func.func @transform_7(%arg0: i32) -> (i32, i32) {
    %c0_i32 = arith.constant 0 : i32
    %c0_i32_0 = arith.constant 0 : i32
    return %arg0, %c0_i32 : i32, i32
  }
}

</mosaic_0001>

<bundles_post_ra>
// kernel: rnn_model_forward.1
= control target key start
LH: loop header
LB: loop body
LE: loop exit
PB: predicated region body
PF: predicated region fallthrough
CT: control target
= control target key end

     0   :  { %12 = vsyncpa [#allocation3], 0  ;;  %s974_s27 = smov [#allocation2]   ;;  %s975_s29 = smov 256   ;;  %s1442_s0 = inlined_call_operand.vmem [shape: s32[64,1], index: 0, kind: input, shape index: {}]   ;;  %s1443_s1 = inlined_call_operand.vmem [shape: s32[64,1], index: 1, kind: input, shape index: {}]   ;;  %s1444_s2 = inlined_call_operand.vmem [shape: s32[8,1], index: 2, kind: input, shape index: {}]   ;;  %s1445_s3 = inlined_call_operand.vmem [shape: f32[64,256], index: 3, kind: input, shape index: {}]   ;;  %s1446_s4 = inlined_call_operand.hbm [shape: f32[64,256], index: 4, kind: input, shape index: {}]   ;;  %s1447_s5 = inlined_call_operand.vmem [shape: f32[64,128], index: 5, kind: input, shape index: {}]   ;;  %s1448_s6 = inlined_call_operand.vmem [shape: f32[1,128], index: 6, kind: input, shape index: {}]   ;;  %s1449_s7 = inlined_call_operand.vmem [shape: f32[8,128], index: 7, kind: output, shape index: {}]  }
   0x1   :  { %s25_s26 = sshll.u32 %s1446_s4, 4  ;;  %s27_s28 = sshll.u32 %s974_s27, 4  ;;  %s26_s26 = int_to_ptr.hbm [resolvable:$true] %s25_s26  ;;  %s28_s28 = int_to_ptr.vmem [resolvable:$true] %s27_s28 }
   0x2   :  { %s976_s30 = smov 16  }
   0x3   :  { %33 = dma.hbm_to_vmem [thread:$0]  %s26_s26, 2048, %s28_s28, [#allocation3], %s975_s29, %s975_s29, %s976_s30  }
   0x4   :  { %972 = dma.done.wait [#allocation3], 2048  }
   0x5   :  { %973 = vsyncadd [#allocation3], 4294965248  ;;  %v977_v0 = vmov 0   ;;  %v61_v1 = vld [vmem:[%s1442_s0] sm:$0xff]  ;;  %v1036_v2 = vld [vmem:[#allocation2 + $0x70] sm:$0xff]  ;;  %v978_v31 = vmov 0.0   ;;  %v59_v38 = vlaneseq }
   0x6   :  { %896 = vset.pattern.permute.xlu0 %v977_v0  ;;  %898 = vset.pattern.permute.xlu2 %v977_v0  ;;  %v1039_v3 = vld [vmem:[#allocation2 + $0x78] sm:$0xff]  ;;  %v1041_v4 = vld [vmem:[#allocation2 + $0x60] sm:$0xff]  ;;  %v1043_v5 = vld [vmem:[#allocation2 + $0x68] sm:$0xff]  ;;  %vm181_vm2 = vcmask 523264   ;;  %s979_s9 = smov 64  }
   0x7   :  { %897 = vset.pattern.permute.xlu1 %v977_v0  ;;  %70 = vperm.xlu0 %896, %v61_v1   ;;  %v1046_v6 = vld [vmem:[#allocation2 + $0x50] sm:$0xff]  ;;  %v1052_v8 = vld [vmem:[#allocation2 + $0x58] sm:$0xff]  ;;  %v1058_v10 = vld [vmem:[#allocation2 + $0x40] sm:$0xff]  ;;  %v1185_v39 = vand.u32 127, %v59_v38 }
   0x8   :  { %300 = vmatpush.msra.mxu2 %v1036_v2  ;;  %320 = vmatpush.msra.mxu3 %v1039_v3  ;;  %v179_v7 = vld [vmem:[%s1445_s3 + $0x70] sm:$0xff]  ;;  %v180_v9 = vld [vmem:[%s1445_s3 + $0x78] sm:$0xff]  ;;  %v177_v11 = vld [vmem:[%s1445_s3 + $0x60] sm:$0xff] }
   0x9   :  { %214 = vmatpush.msra.mxu0 %v179_v7  ;;  %255 = vmatpush.msra.mxu1 %v180_v9  ;;  %v178_v12 = vld [vmem:[%s1445_s3 + $0x68] sm:$0xff]  ;;  %v101_v14 = vld [vmem:[%s1443_s1] sm:$0xff]  ;;  %v1073_v15 = vld [vmem:[#allocation2 + $0x30] sm:$0xff]  ;;  %vm288_vm7 = vcmp.lt.s32.totalorder %v1185_v39, 32 }
   0xa   :  { %301 = vmatpush.msra.mxu2 %v1041_v4  ;;  %321 = vmatpush.msra.mxu3 %v1043_v5  ;;  %v1067_v13 = vld [vmem:[#allocation2 + $0x48] sm:$0xff]  ;;  %v1076_v16 = vld [vmem:[#allocation2 + $0x38] sm:$0xff]  ;;  %v175_v17 = vld [vmem:[%s1445_s3 + $0x50] sm:$0xff] }
   0xb   :  { %215 = vmatpush.msra.mxu0 %v177_v11  ;;  %256 = vmatpush.msra.mxu1 %v178_v12  ;;  %v176_v18 = vld [vmem:[%s1445_s3 + $0x58] sm:$0xff]  ;;  %v1087_v19 = vld [vmem:[#allocation2 + $0x20] sm:$0xff]  ;;  %v1089_v20 = vld [vmem:[#allocation2 + $0x28] sm:$0xff] }
   0xc   :  { %302 = vmatpush.msra.mxu2 %v1046_v6  ;;  %322 = vmatpush.msra.mxu3 %v1052_v8  ;;  %v173_v21 = vld [vmem:[%s1445_s3 + $0x40] sm:$0xff]  ;;  %v174_v22 = vld [vmem:[%s1445_s3 + $0x48] sm:$0xff]  ;;  %v1099_v23 = vld [vmem:[#allocation2 + $0x10] sm:$0xff] }
   0xd   :  { %216 = vmatpush.msra.mxu0 %v175_v17  ;;  %257 = vmatpush.msra.mxu1 %v176_v18  ;;  %v1101_v24 = vld [vmem:[#allocation2 + $0x18] sm:$0xff]  ;;  %v171_v25 = vld [vmem:[%s1445_s3 + $0x30] sm:$0xff]  ;;  %v1109_v27 = vld [vmem:[#allocation2] sm:$0xff] }
   0xe   :  { %303 = vmatpush.msra.mxu2 %v1058_v10  ;;  %323 = vmatpush.msra.mxu3 %v1067_v13  ;;  %v172_v26 = vld [vmem:[%s1445_s3 + $0x38] sm:$0xff]  ;;  %v1111_v28 = vld [vmem:[#allocation2 + $0x8] sm:$0xff]  ;;  %v169_v29 = vld [vmem:[%s1445_s3 + $0x20] sm:$0xff] }
   0xf   :  { %110 = vperm.xlu0 %896, %v101_v14   ;;  %217 = vmatpush.msra.mxu0 %v173_v21  ;;  %v170_v30 = vld [vmem:[%s1445_s3 + $0x28] sm:$0xff]  ;;  %v167_v32 = vld [vmem:[%s1445_s3 + $0x10] sm:$0xff]  ;;  %v168_v33 = vld [vmem:[%s1445_s3 + $0x18] sm:$0xff]  ;;  %v980_v21 = vmov 7  }
  0x10   :  { %304 = vmatpush.msra.mxu2 %v1073_v15  ;;  %324 = vmatpush.msra.mxu3 %v1076_v16  ;;  %v165_v34 = vld [vmem:[%s1445_s3] sm:$0xff]  ;;  %v166_v35 = vld [vmem:[%s1445_s3 + $0x8] sm:$0xff]  ;;  %v103_v43 = vld [vmem:[%s1443_s1 + $0x10] sm:$0xff] }
  0x11   :  { %258 = vmatpush.msra.mxu1 %v174_v22  ;;  %218 = vmatpush.msra.mxu0 %v171_v25  ;;  %v62_v36 = vld [vmem:[%s1442_s0 + $0x8] sm:$0xff]  ;;  %v104_v44 = vld [vmem:[%s1443_s1 + $0x18] sm:$0xff]  ;;  %v107_v52 = vld [vmem:[%s1443_s1 + $0x30] sm:$0xff]  ;;  %v349_v22 = vsel %vm288_vm7, 0, %v980_v21  ;;  %v1259_v25 = vsel %vm288_vm7, 7, %v977_v0 }
  0x12   :  { %305 = vmatpush.msra.mxu2 %v1087_v19  ;;  %325 = vmatpush.msra.mxu3 %v1089_v20  ;;  %v102_v42 = vld [vmem:[%s1443_s1 + $0x8] sm:$0xff]  ;;  %v108_v57 = vld [vmem:[%s1443_s1 + $0x38] sm:$0xff]  ;;  %v42_v59 = vld [vmem:[%s1444_s2] sm:$0xff] }
  0x13   :  { %259 = vmatpush.msra.mxu1 %v172_v26  ;;  %219 = vmatpush.msra.mxu0 %v169_v29  ;;  %v66_v45 = vld [vmem:[%s1442_s0 + $0x28] sm:$0xff]  ;;  %v63_v60 = vld [vmem:[%s1442_s0 + $0x10] sm:$0xff]  ;;  %v64_v61 = vld [vmem:[%s1442_s0 + $0x18] sm:$0xff] }
  0x14   :  { %306 = vmatpush.msra.mxu2 %v1099_v23  ;;  %326 = vmatpush.msra.mxu3 %v1101_v24  ;;  %v105_v62 = vld [vmem:[%s1443_s1 + $0x20] sm:$0xff]  ;;  %v67_v63 = vld [vmem:[%s1442_s0 + $0x30] sm:$0xff]  ;;  %v68_v1 = vld [vmem:[%s1442_s0 + $0x38] sm:$0xff] }
  0x15   :  { %260 = vmatpush.msra.mxu1 %v170_v30  ;;  %220 = vmatpush.msra.mxu0 %v167_v32 }
  0x16   :  { %307 = vmatpush.msra.mxu2 %v1109_v27  ;;  %327 = vmatpush.msra.mxu3 %v1111_v28 }
  0x17   :  { %308 = vmatmul.f32.vlgmr.msra.gmra.mxu2 %v978_v31  ;;  %328 = vmatmul.f32.vlgmr.msra.gmra.mxu3 %v978_v31 }
  0x18   :  { %367 = vmatpush.msrb.mxu2 %v1036_v2  ;;  %387 = vmatpush.msrb.mxu3 %v1039_v3 }
  0x19   :  { %261 = vmatpush.msra.mxu1 %v168_v33  ;;  %221 = vmatpush.msra.mxu0 %v165_v34 }
  0x1a   :  { %368 = vmatpush.msrb.mxu2 %v1041_v4  ;;  %388 = vmatpush.msrb.mxu3 %v1043_v5 }
  0x1b   :  { %262 = vmatpush.msra.mxu1 %v166_v35  ;;  %73 = vperm.xlu2 %898, %v62_v36  }
  0x1c   :  { %369 = vmatpush.msrb.mxu2 %v1046_v6  ;;  %389 = vmatpush.msrb.mxu3 %v1052_v8 }
  0x1d   :  { %559 = vmatpush.msrb.mxu0 %v1036_v2  ;;  %579 = vmatpush.msrb.mxu1 %v1039_v3 }
  0x1e   :  { %370 = vmatpush.msrb.mxu2 %v1058_v10  ;;  %390 = vmatpush.msrb.mxu3 %v1067_v13 }
  0x1f   :  { %560 = vmatpush.msrb.mxu0 %v1041_v4  ;;  %580 = vmatpush.msrb.mxu1 %v1043_v5 }
  0x20   :  { %371 = vmatpush.msrb.mxu2 %v1073_v15  ;;  %391 = vmatpush.msrb.mxu3 %v1076_v16 }
  0x21   :  { %561 = vmatpush.msrb.mxu0 %v1046_v6  ;;  %581 = vmatpush.msrb.mxu1 %v1052_v8 }
  0x22   :  { %372 = vmatpush.msrb.mxu2 %v1087_v19  ;;  %392 = vmatpush.msrb.mxu3 %v1089_v20 }
  0x23   :  { %562 = vmatpush.msrb.mxu0 %v1058_v10  ;;  %582 = vmatpush.msrb.mxu1 %v1067_v13 }
  0x24   :  { %373 = vmatpush.msrb.mxu2 %v1099_v23  ;;  %393 = vmatpush.msrb.mxu3 %v1101_v24 }
  0x25   :  { %563 = vmatpush.msrb.mxu0 %v1073_v15  ;;  %583 = vmatpush.msrb.mxu1 %v1076_v16 }
  0x26   :  { %374 = vmatpush.msrb.mxu2 %v1109_v27  ;;  %394 = vmatpush.msrb.mxu3 %v1111_v28 }
  0x27   :  { %564 = vmatpush.msrb.mxu0 %v1087_v19  ;;  %584 = vmatpush.msrb.mxu1 %v1089_v20 }
  0x28   :  { %431 = vmatpush.msra.mxu2 %v1036_v2  ;;  %451 = vmatpush.msra.mxu3 %v1039_v3 }
  0x29   :  { %565 = vmatpush.msrb.mxu0 %v1099_v23  ;;  %585 = vmatpush.msrb.mxu1 %v1101_v24 }
  0x2a   :  { %432 = vmatpush.msra.mxu2 %v1041_v4  ;;  %452 = vmatpush.msra.mxu3 %v1043_v5 }
  0x2b   :  { %566 = vmatpush.msrb.mxu0 %v1109_v27  ;;  %586 = vmatpush.msrb.mxu1 %v1111_v28 }
  0x2c   :  { %433 = vmatpush.msra.mxu2 %v1046_v6  ;;  %453 = vmatpush.msra.mxu3 %v1052_v8 }
  0x2d   :  { %113 = vperm.xlu2 %898, %v102_v42  }
  0x2e   :  { %434 = vmatpush.msra.mxu2 %v1058_v10  ;;  %454 = vmatpush.msra.mxu3 %v1067_v13 }
  0x30   :  { %435 = vmatpush.msra.mxu2 %v1073_v15  ;;  %455 = vmatpush.msra.mxu3 %v1076_v16 }
  0x32   :  { %436 = vmatpush.msra.mxu2 %v1087_v19  ;;  %456 = vmatpush.msra.mxu3 %v1089_v20 }
  0x34   :  { %437 = vmatpush.msra.mxu2 %v1099_v23  ;;  %457 = vmatpush.msra.mxu3 %v1101_v24 }
  0x35   :  { %116 = vperm.xlu2 %898, %v103_v43  }
  0x36   :  { %438 = vmatpush.msra.mxu2 %v1109_v27  ;;  %458 = vmatpush.msra.mxu3 %v1111_v28 }
  0x3d   :  { %119 = vperm.xlu2 %898, %v104_v44  }
  0x45   :  { %85 = vperm.xlu2 %898, %v66_v45  }
  0x4d   :  { %128 = vperm.xlu2 %898, %v107_v52  }
  0x55   :  { %131 = vperm.xlu2 %898, %v108_v57  }
  0x75   :  { %v74_v7 = vpop.permute.xlu2 %73 }
  0x76   :  { %vm94_vm4 = vcmp.eq.s32.totalorder %v1185_v39, %v74_v7 }
  0x79   :  { %v71_v37 = vpop.permute.xlu0 %70 }
  0x7a   :  { %vm93_vm0 = vcmp.eq.s32.totalorder %v1185_v39, %v71_v37 }
  0x81   :  { %v111_v40 = vpop.permute.xlu0 %110 }
  0x82   :  { %vm133_vm1 = vcmp.eq.s32.totalorder %v1185_v39, %v111_v40 }
  0x83   :  { %vm141_vm3 = vmor %vm93_vm0, %vm133_vm1 }
  0x84   :  { %v844_v41 = vsel %vm141_vm3, 1.0, %v978_v31 }
  0x85   :  { %852 = vmatmul.msk.f32.vlgmr.msra.gmra.mxu0 %vm181_vm2, %v844_v41  ;;  %860 = vmatmul.msk.f32.vlgmr.msra.gmra.mxu1 %vm181_vm2, %v844_v41 }
  0x86   :  { %687 = vmatpush.msra.mxu0 %v1036_v2  ;;  %707 = vmatpush.msra.mxu1 %v1039_v3 }
  0x87   :  { %v114_v9 = vpop.permute.xlu2 %113 }
  0x88   :  { %688 = vmatpush.msra.mxu0 %v1041_v4  ;;  %708 = vmatpush.msra.mxu1 %v1043_v5  ;;  %vm134_vm5 = vcmp.eq.s32.totalorder %v1185_v39, %v114_v9 }
  0x89   :  { %vm142_vm6 = vmor %vm94_vm4, %vm134_vm5 }
  0x8a   :  { %689 = vmatpush.msra.mxu0 %v1046_v6  ;;  %709 = vmatpush.msra.mxu1 %v1052_v8  ;;  %v845_v11 = vsel %vm142_vm6, 1.0, %v978_v31 }
  0x8c   :  { %690 = vmatpush.msra.mxu0 %v1058_v10  ;;  %710 = vmatpush.msra.mxu1 %v1067_v13 }
  0x8d   :  { %853 = vmatmul.msk.f32.gmra.mxu0 %vm181_vm2, %v845_v11  ;;  %861 = vmatmul.msk.f32.gmra.mxu1 %vm181_vm2, %v845_v11 }
  0x8e   :  { %691 = vmatpush.msra.mxu0 %v1073_v15  ;;  %711 = vmatpush.msra.mxu1 %v1076_v16 }
  0x8f   :  { %v117_v35 = vpop.permute.xlu2 %116 }
  0x90   :  { %692 = vmatpush.msra.mxu0 %v1087_v19  ;;  %712 = vmatpush.msra.mxu1 %v1089_v20  ;;  %vm135_vm10 = vcmp.eq.s32.totalorder %v1185_v39, %v117_v35 }
  0x92   :  { %693 = vmatpush.msra.mxu0 %v1099_v23  ;;  %713 = vmatpush.msra.mxu1 %v1101_v24 }
  0x94   :  { %694 = vmatpush.msra.mxu0 %v1109_v27  ;;  %714 = vmatpush.msra.mxu1 %v1111_v28 }
  0x97   :  { %v120_v37 = vpop.permute.xlu2 %119 }
  0x98   :  { %vm136_vm13 = vcmp.eq.s32.totalorder %v1185_v39, %v120_v37 }
  0x9a   :  { %v309_v46 = vpop.f32.mrf.mxu2  ;;  %v329_v47 = vpop.f32.mrf.mxu3 }
 0x102   :  { %v223_v48 = vpop.f32.mrf.mxu0  ;;  %v264_v49 = vpop.f32.mrf.mxu1 }
 0x103   :  { %v332_v50 = vadd.f32 %v309_v46, %v223_v48  ;;  %v333_v51 = vadd.f32 %v329_v47, %v264_v49 }
 0x105   :  { %900 = vtanh.f32 %v332_v50 }
 0x106   :  { %902 = vtanh.f32 %v333_v51 }
 0x10a   :  { %v226_v41 = vpop.f32.mrf.mxu0  ;;  %v267_v45 = vpop.f32.mrf.mxu1 }
 0x10b   :  { %v901_v53 = vpop.eup %900 }
 0x10c   :  { %v336_v54 = vmul.f32 0.5, %v901_v53  ;;  %v903_v56 = vpop.eup %902  ;;  %v981_v53 = vmov 6  }
 0x10d   :  { %v337_v18 = vmul.f32 0.5, %v903_v56 }
 0x10e   :  { %v338_v55 = vadd.f32 0.5, %v336_v54  ;;  %v416_v54 = vsel %vm288_vm7, 1, %v981_v53 }
 0x10f   :  { %v339_v29 = vadd.f32 0.5, %v337_v18 }
 0x110   :  { %v341_v58 = vmul.f32 %v903_v56, %v338_v55  ;;  %v340_v12 = vmul.f32 0.0, %v338_v55 }
 0x112   :  { %343 = vrot.lane.b32.xlu1 %v341_v58, %s979_s9 }
 0x11a   :  { %351 = vperm.xlu1 %897, %v42_v59  }
 0x122   :  { %76 = vperm.xlu1 %897, %v63_v60  }
 0x12a   :  { %79 = vperm.xlu1 %897, %v64_v61  }
 0x132   :  { %122 = vperm.xlu1 %897, %v105_v62  }
 0x13a   :  { %88 = vperm.xlu1 %897, %v67_v63  }
 0x142   :  { %91 = vperm.xlu1 %897, %v68_v1  }
 0x184   :  { %v344_v14 = vpop.permute.xlu1 %343 }
 0x185   :  { %v346_v17 = vadd.f32 %v344_v14, %v340_v12 }
 0x187   :  { %904 = vtanh.f32 %v346_v17 }
 0x18c   :  { %v1261_v26 = vpop.permute.xlu1 %351 }
 0x18d   :  { %v905_v30 = vpop.eup %904  ;;  %vm353_vm8 = vcmp.lt.s32.totalorder %v349_v22, %v1261_v26  ;;  %vm801_vm9 = vcmp.lt.s32.totalorder %v1259_v25, %v1261_v26  ;;  %vm417_vm0 = vcmp.lt.s32.totalorder %v416_v54, %v1261_v26 }
 0x18e   :  { %v348_v32 = vmul.f32 %v905_v30, %v339_v29  ;;  %v355_v33 = vsel %vm353_vm8, %v346_v17, 0.0  ;;  %v65_v29 = vld [vmem:[%s1442_s0 + $0x20] sm:$0xff]  ;;  %v106_v30 = vld [vmem:[%s1443_s1 + $0x28] sm:$0xff] }
 0x190   :  { %v354_v34 = vsel %vm353_vm8, %v348_v32, 0.0 }
 0x191   :  { %868 = vmatmul.msk.f32.vlgmr.msrb.gmra.mxu2 %vm181_vm2, %v354_v34  ;;  %869 = vmatmul.msk.f32.vlgmr.msrb.gmra.mxu3 %vm181_vm2, %v354_v34 }
 0x192   :  { %495 = vmatpush.msrb.mxu2 %v1036_v2  ;;  %515 = vmatpush.msrb.mxu3 %v1039_v3 }
 0x194   :  { %v77_v0 = vpop.permute.xlu1 %76  ;;  %496 = vmatpush.msrb.mxu2 %v1041_v4  ;;  %516 = vmatpush.msrb.mxu3 %v1043_v5 }
 0x195   :  { %vm95_vm11 = vcmp.eq.s32.totalorder %v1185_v39, %v77_v0 }
 0x196   :  { %vm143_vm12 = vmor %vm95_vm11, %vm135_vm10  ;;  %497 = vmatpush.msrb.mxu2 %v1046_v6  ;;  %517 = vmatpush.msrb.mxu3 %v1052_v8 }
 0x197   :  { %v846_v36 = vsel %vm143_vm12, 1.0, %v978_v31 }
 0x198   :  { %854 = vmatmul.msk.f32.gmra.mxu0 %vm181_vm2, %v846_v36  ;;  %862 = vmatmul.msk.f32.gmra.mxu1 %vm181_vm2, %v846_v36 }
 0x199   :  { %498 = vmatpush.msrb.mxu2 %v1058_v10  ;;  %518 = vmatpush.msrb.mxu3 %v1067_v13 }
 0x19b   :  { %499 = vmatpush.msrb.mxu2 %v1073_v15  ;;  %519 = vmatpush.msrb.mxu3 %v1076_v16 }
 0x19c   :  { %v80_v38 = vpop.permute.xlu1 %79 }
 0x19d   :  { %vm96_vm14 = vcmp.eq.s32.totalorder %v1185_v39, %v80_v38  ;;  %500 = vmatpush.msrb.mxu2 %v1087_v19  ;;  %520 = vmatpush.msrb.mxu3 %v1089_v20 }
 0x19e   :  { %vm144_vm15 = vmor %vm96_vm14, %vm136_vm13 }
 0x19f   :  { %v847_v40 = vsel %vm144_vm15, 1.0, %v978_v31  ;;  %501 = vmatpush.msrb.mxu2 %v1099_v23  ;;  %521 = vmatpush.msrb.mxu3 %v1101_v24 }
 0x1a0   :  { %855 = vmatmul.msk.f32.gmra.mxu0 %vm181_vm2, %v847_v40  ;;  %863 = vmatmul.msk.f32.gmra.mxu1 %vm181_vm2, %v847_v40  ;;  %v86_v40 = vpop.permute.xlu2 %85 }
 0x1a1   :  { %502 = vmatpush.msrb.mxu2 %v1109_v27  ;;  %522 = vmatpush.msrb.mxu3 %v1111_v28  ;;  %vm98_vm6 = vcmp.eq.s32.totalorder %v1185_v39, %v86_v40 }
 0x1a4   :  { %v123_v38 = vpop.permute.xlu1 %122 }
 0x1a5   :  { %vm137_vm3 = vcmp.eq.s32.totalorder %v1185_v39, %v123_v38 }
 0x214   :  { %v376_v42 = vpop.f32.mrf.mxu2  ;;  %v396_v43 = vpop.f32.mrf.mxu3 }
 0x215   :  { %v399_v44 = vadd.f32 %v376_v42, %v226_v41  ;;  %v400_v46 = vadd.f32 %v396_v43, %v267_v45  ;;  %v229_v63 = vpop.f32.mrf.mxu0  ;;  %v270_v11 = vpop.f32.mrf.mxu1 }
 0x217   :  { %906 = vtanh.f32 %v399_v44 }
 0x218   :  { %908 = vtanh.f32 %v400_v46 }
 0x21d   :  { %v907_v47 = vpop.eup %906 }
 0x21e   :  { %v403_v48 = vmul.f32 0.5, %v907_v47  ;;  %v909_v50 = vpop.eup %908  ;;  %v89_v47 = vpop.permute.xlu1 %88 }
 0x21f   :  { %v404_v58 = vmul.f32 0.5, %v909_v50  ;;  %vm99_vm11 = vcmp.eq.s32.totalorder %v1185_v39, %v89_v47 }
 0x220   :  { %v405_v49 = vadd.f32 0.5, %v403_v48 }
 0x221   :  { %v406_v59 = vadd.f32 0.5, %v404_v58 }
 0x222   :  { %v408_v51 = vmul.f32 %v909_v50, %v405_v49  ;;  %v407_v52 = vmul.f32 %v405_v49, %v355_v33  ;;  %v129_v49 = vpop.permute.xlu2 %128  ;;  %v983_v50 = vmov 4  }
 0x223   :  { %vm139_vm12 = vcmp.eq.s32.totalorder %v1185_v39, %v129_v49 }
 0x224   :  { %410 = vrot.lane.b32.xlu0 %v408_v51, %s979_s9  ;;  %vm147_vm13 = vmor %vm99_vm11, %vm139_vm12  ;;  %v544_v51 = vsel %vm288_vm7, 3, %v983_v50 }
 0x296   :  { %v411_v55 = vpop.permute.xlu0 %410 }
 0x297   :  { %v413_v56 = vadd.f32 %v411_v55, %v407_v52 }
 0x299   :  { %910 = vtanh.f32 %v413_v56  ;;  %v419_v57 = vsel %vm417_vm0, %v413_v56, %v355_v33  ;;  %v982_v33 = vmov 5  }
 0x29f   :  { %v911_v60 = vpop.eup %910 }
 0x2a0   :  { %v415_v61 = vmul.f32 %v911_v60, %v406_v59 }
 0x2a2   :  { %v418_v62 = vsel %vm417_vm0, %v415_v61, %v354_v34  ;;  %v480_v34 = vsel %vm288_vm7, 2, %v982_v33 }
 0x2a3   :  { %870 = vmatmul.msk.f32.vlgmr.msra.gmra.mxu2 %vm181_vm2, %v418_v62  ;;  %871 = vmatmul.msk.f32.vlgmr.msra.gmra.mxu3 %vm181_vm2, %v418_v62  ;;  %vm481_vm1 = vcmp.lt.s32.totalorder %v480_v34, %v1261_v26  ;;  %v984_v34 = vmov 3  }
 0x2a4   :  { %623 = vmatpush.msra.mxu2 %v1036_v2  ;;  %643 = vmatpush.msra.mxu3 %v1039_v3 }
 0x2a6   :  { %624 = vmatpush.msra.mxu2 %v1041_v4  ;;  %644 = vmatpush.msra.mxu3 %v1043_v5 }
 0x2a8   :  { %625 = vmatpush.msra.mxu2 %v1046_v6  ;;  %645 = vmatpush.msra.mxu3 %v1052_v8 }
 0x2aa   :  { %626 = vmatpush.msra.mxu2 %v1058_v10  ;;  %646 = vmatpush.msra.mxu3 %v1067_v13 }
 0x2ac   :  { %627 = vmatpush.msra.mxu2 %v1073_v15  ;;  %647 = vmatpush.msra.mxu3 %v1076_v16 }
 0x2ae   :  { %628 = vmatpush.msra.mxu2 %v1087_v19  ;;  %648 = vmatpush.msra.mxu3 %v1089_v20 }
 0x2b0   :  { %629 = vmatpush.msra.mxu2 %v1099_v23  ;;  %649 = vmatpush.msra.mxu3 %v1101_v24 }
 0x2b2   :  { %630 = vmatpush.msra.mxu2 %v1109_v27  ;;  %650 = vmatpush.msra.mxu3 %v1111_v28 }
 0x326   :  { %v440_v1 = vpop.f32.mrf.mxu2  ;;  %v460_v7 = vpop.f32.mrf.mxu3 }
 0x327   :  { %v463_v9 = vadd.f32 %v440_v1, %v229_v63  ;;  %v464_v12 = vadd.f32 %v460_v7, %v270_v11 }
 0x329   :  { %912 = vtanh.f32 %v463_v9 }
 0x32a   :  { %914 = vtanh.f32 %v464_v12 }
 0x32f   :  { %v913_v14 = vpop.eup %912 }
 0x330   :  { %v467_v17 = vmul.f32 0.5, %v913_v14  ;;  %v915_v21 = vpop.eup %914 }
 0x331   :  { %v468_v37 = vmul.f32 0.5, %v915_v21 }
 0x332   :  { %v469_v18 = vadd.f32 0.5, %v467_v17 }
 0x333   :  { %v470_v41 = vadd.f32 0.5, %v468_v37 }
 0x334   :  { %v472_v22 = vmul.f32 %v915_v21, %v469_v18  ;;  %v471_v32 = vmul.f32 %v469_v18, %v419_v57 }
 0x336   :  { %474 = vrot.lane.b32.xlu0 %v472_v22, %s979_s9 }
 0x33e   :  { %82 = vperm.xlu0 %896, %v65_v29  }
 0x346   :  { %125 = vperm.xlu0 %896, %v106_v30  }
 0x3a8   :  { %v475_v35 = vpop.permute.xlu0 %474 }
 0x3a9   :  { %v477_v0 = vadd.f32 %v475_v35, %v471_v32  ;;  %v608_v35 = vsel %vm288_vm7, 4, %v984_v34 }
 0x3ab   :  { %916 = vtanh.f32 %v477_v0  ;;  %v1328_v36 = vsel %vm481_vm1, %v477_v0, %v419_v57 }
 0x3b0   :  { %v83_v42 = vpop.permute.xlu0 %82 }
 0x3b1   :  { %v917_v43 = vpop.eup %916  ;;  %vm97_vm4 = vcmp.eq.s32.totalorder %v1185_v39, %v83_v42 }
 0x3b2   :  { %v479_v44 = vmul.f32 %v917_v43, %v470_v41  ;;  %vm145_vm5 = vmor %vm97_vm4, %vm137_vm3  ;;  %vm609_vm3 = vcmp.lt.s32.totalorder %v608_v35, %v1261_v26 }
 0x3b3   :  { %v848_v45 = vsel %vm145_vm5, 1.0, %v978_v31 }
 0x3b4   :  { %856 = vmatmul.msk.f32.gmra.mxu0 %vm181_vm2, %v848_v45  ;;  %864 = vmatmul.msk.f32.gmra.mxu1 %vm181_vm2, %v848_v45  ;;  %v1337_v46 = vsel %vm481_vm1, %v479_v44, %v418_v62  ;;  %vm545_vm1 = vcmp.lt.s32.totalorder %v544_v51, %v1261_v26 }
 0x3b5   :  { %872 = vmatmul.msk.f32.vlgmr.msrb.gmra.mxu2 %vm181_vm2, %v1337_v46  ;;  %873 = vmatmul.msk.f32.vlgmr.msrb.gmra.mxu3 %vm181_vm2, %v1337_v46 }
 0x3b6   :  { %751 = vmatpush.msrb.mxu2 %v1036_v2  ;;  %771 = vmatpush.msrb.mxu3 %v1039_v3  ;;  %v92_v3 = vpop.permute.xlu1 %91 }
 0x3b7   :  { %vm100_vm14 = vcmp.eq.s32.totalorder %v1185_v39, %v92_v3 }
 0x3b8   :  { %v126_v48 = vpop.permute.xlu0 %125  ;;  %752 = vmatpush.msrb.mxu2 %v1041_v4  ;;  %772 = vmatpush.msrb.mxu3 %v1043_v5  ;;  %v850_v4 = vsel %vm147_vm13, 1.0, %v978_v31  ;;  %v132_v5 = vpop.permute.xlu2 %131 }
 0x3b9   :  { %vm138_vm8 = vcmp.eq.s32.totalorder %v1185_v39, %v126_v48  ;;  %vm140_vm15 = vcmp.eq.s32.totalorder %v1185_v39, %v132_v5  ;;  %v810_v39 = vld [vmem:[%s1447_s5 + $0x38] sm:$0xff] }
 0x3ba   :  { %vm146_vm10 = vmor %vm98_vm6, %vm138_vm8  ;;  %753 = vmatpush.msrb.mxu2 %v1046_v6  ;;  %773 = vmatpush.msrb.mxu3 %v1052_v8  ;;  %v232_v8 = vpop.f32.mrf.mxu0 }
 0x3bb   :  { %v849_v2 = vsel %vm146_vm10, 1.0, %v978_v31  ;;  %vm148_vm0 = vmor %vm100_vm14, %vm140_vm15 }
 0x3bc   :  { %857 = vmatmul.msk.f32.gmra.mxu0 %vm181_vm2, %v849_v2  ;;  %865 = vmatmul.msk.f32.gmra.mxu1 %vm181_vm2, %v849_v2  ;;  %v851_v6 = vsel %vm148_vm0, 1.0, %v978_v31 }
 0x3bd   :  { %754 = vmatpush.msrb.mxu2 %v1058_v10  ;;  %774 = vmatpush.msrb.mxu3 %v1067_v13 }
 0x3bf   :  { %755 = vmatpush.msrb.mxu2 %v1073_v15  ;;  %775 = vmatpush.msrb.mxu3 %v1076_v16  ;;  %v273_v16 = vpop.f32.mrf.mxu1 }
 0x3c1   :  { %756 = vmatpush.msrb.mxu2 %v1087_v19  ;;  %776 = vmatpush.msrb.mxu3 %v1089_v20 }
 0x3c3   :  { %757 = vmatpush.msrb.mxu2 %v1099_v23  ;;  %777 = vmatpush.msrb.mxu3 %v1101_v24 }
 0x3c4   :  { %858 = vmatmul.msk.f32.gmra.mxu0 %vm181_vm2, %v850_v4  ;;  %866 = vmatmul.msk.f32.gmra.mxu1 %vm181_vm2, %v850_v4 }
 0x3c5   :  { %758 = vmatpush.msrb.mxu2 %v1109_v27  ;;  %778 = vmatpush.msrb.mxu3 %v1111_v28 }
 0x3cc   :  { %859 = vmatmul.msk.f32.gmra.mxu0 %vm181_vm2, %v851_v6  ;;  %867 = vmatmul.msk.f32.gmra.mxu1 %vm181_vm2, %v851_v6  ;;  %v985_v6 = vmov 2  }
 0x431   :  { %v235_v60 = vpop.f32.mrf.mxu0  ;;  %v276_v61 = vpop.f32.mrf.mxu1 }
 0x438   :  { %v504_v10 = vpop.f32.mrf.mxu2  ;;  %v524_v13 = vpop.f32.mrf.mxu3 }
 0x439   :  { %v527_v15 = vadd.f32 %v504_v10, %v232_v8  ;;  %v528_v19 = vadd.f32 %v524_v13, %v273_v16  ;;  %v238_v62 = vpop.f32.mrf.mxu0  ;;  %v279_v63 = vpop.f32.mrf.mxu1  ;;  %v672_v8 = vsel %vm288_vm7, 5, %v985_v6 }
 0x43a   :  { %vm673_vm4 = vcmp.lt.s32.totalorder %v672_v8, %v1261_v26 }
 0x43b   :  { %918 = vtanh.f32 %v527_v15 }
 0x43c   :  { %920 = vtanh.f32 %v528_v19 }
 0x441   :  { %v919_v20 = vpop.eup %918  ;;  %v241_v1 = vpop.f32.mrf.mxu0 }
 0x442   :  { %v531_v23 = vmul.f32 0.5, %v919_v20  ;;  %v921_v27 = vpop.eup %920  ;;  %v282_v7 = vpop.f32.mrf.mxu1 }
 0x443   :  { %v532_v55 = vmul.f32 0.5, %v921_v27 }
 0x444   :  { %v533_v24 = vadd.f32 0.5, %v531_v23 }
 0x445   :  { %v534_v56 = vadd.f32 0.5, %v532_v55 }
 0x446   :  { %v536_v28 = vmul.f32 %v921_v27, %v533_v24  ;;  %v535_v31 = vmul.f32 %v533_v24, %v1328_v36 }
 0x448   :  { %538 = vrot.lane.b32.xlu0 %v536_v28, %s979_s9 }
 0x449   :  { %v1383_v9 = vpop.f32.mrf.mxu0 }
 0x44a   :  { %v1385_v11 = vpop.f32.mrf.mxu1 }
 0x4ba   :  { %v539_v52 = vpop.permute.xlu0 %538 }
 0x4bb   :  { %v541_v53 = vadd.f32 %v539_v52, %v535_v31 }
 0x4bd   :  { %922 = vtanh.f32 %v541_v53  ;;  %v547_v54 = vsel %vm545_vm1, %v541_v53, %v1328_v36 }
 0x4c3   :  { %v923_v57 = vpop.eup %922 }
 0x4c4   :  { %v543_v58 = vmul.f32 %v923_v57, %v534_v56  ;;  %v986_v57 = vmov 1  }
 0x4c6   :  { %v546_v59 = vsel %vm545_vm1, %v543_v58, %v1337_v46  ;;  %v736_v58 = vsel %vm288_vm7, 6, %v986_v57 }
 0x4c7   :  { %874 = vmatmul.msk.f32.vlgmr.msrb.gmra.mxu0 %vm181_vm2, %v546_v59  ;;  %875 = vmatmul.msk.f32.vlgmr.msrb.gmra.mxu1 %vm181_vm2, %v546_v59  ;;  %vm737_vm5 = vcmp.lt.s32.totalorder %v736_v58, %v1261_v26 }
 0x4c8   :  { %826 = vmatpush.msrb.mxu0 %v810_v39 }
 0x544   :  { %v568_v12 = vpop.f32.mrf.mxu0  ;;  %v588_v14 = vpop.f32.mrf.mxu1 }
 0x545   :  { %v591_v17 = vadd.f32 %v568_v12, %v235_v60  ;;  %v592_v18 = vadd.f32 %v588_v14, %v276_v61  ;;  %v809_v14 = vld [vmem:[%s1447_s5 + $0x30] sm:$0xff] }
 0x546   :  { %827 = vmatpush.msrb.mxu0 %v809_v14 }
 0x547   :  { %924 = vtanh.f32 %v591_v17 }
 0x548   :  { %926 = vtanh.f32 %v592_v18 }
 0x54d   :  { %v925_v21 = vpop.eup %924 }
 0x54e   :  { %v595_v22 = vmul.f32 0.5, %v925_v21  ;;  %v927_v30 = vpop.eup %926 }
 0x54f   :  { %v596_v38 = vmul.f32 0.5, %v927_v30 }
 0x550   :  { %v597_v29 = vadd.f32 0.5, %v595_v22 }
 0x551   :  { %v598_v40 = vadd.f32 0.5, %v596_v38  ;;  %v803_v38 = vld [vmem:[%s1447_s5] sm:$0xff] }
 0x552   :  { %v600_v32 = vmul.f32 %v927_v30, %v597_v29  ;;  %v599_v33 = vmul.f32 %v597_v29, %v547_v54 }
 0x554   :  { %602 = vrot.lane.b32.xlu0 %v600_v32, %s979_s9 }
 0x5c6   :  { %v603_v0 = vpop.permute.xlu0 %602 }
 0x5c7   :  { %v605_v36 = vadd.f32 %v603_v0, %v599_v33  ;;  %v808_v0 = vld [vmem:[%s1447_s5 + $0x28] sm:$0xff] }
 0x5c8   :  { %828 = vmatpush.msrb.mxu0 %v808_v0 }
 0x5c9   :  { %928 = vtanh.f32 %v605_v36  ;;  %v611_v37 = vsel %vm609_vm3, %v605_v36, %v547_v54  ;;  %v805_v36 = vld [vmem:[%s1447_s5 + $0x10] sm:$0xff] }
 0x5cf   :  { %v929_v41 = vpop.eup %928 }
 0x5d0   :  { %v607_v42 = vmul.f32 %v929_v41, %v598_v40 }
 0x5d2   :  { %v610_v43 = vsel %vm609_vm3, %v607_v42, %v546_v59 }
 0x5d3   :  { %876 = vmatmul.msk.f32.vlgmr.msra.gmra.mxu2 %vm181_vm2, %v610_v43  ;;  %877 = vmatmul.msk.f32.vlgmr.msra.gmra.mxu3 %vm181_vm2, %v610_v43 }
 0x656   :  { %v632_v44 = vpop.f32.mrf.mxu2  ;;  %v652_v45 = vpop.f32.mrf.mxu3 }
 0x657   :  { %v655_v46 = vadd.f32 %v632_v44, %v238_v62  ;;  %v656_v47 = vadd.f32 %v652_v45, %v279_v63 }
 0x659   :  { %930 = vtanh.f32 %v655_v46 }
 0x65a   :  { %932 = vtanh.f32 %v656_v47  ;;  %v899_v47 = vld [vmem:[%s1448_s6] ss:$0 sm:$0xff] }
 0x65f   :  { %v931_v48 = vpop.eup %930 }
 0x660   :  { %v659_v49 = vmul.f32 0.5, %v931_v48  ;;  %v933_v3 = vpop.eup %932 }
 0x661   :  { %v660_v16 = vmul.f32 0.5, %v933_v3 }
 0x662   :  { %v661_v2 = vadd.f32 0.5, %v659_v49 }
 0x663   :  { %v662_v19 = vadd.f32 0.5, %v660_v16 }
 0x664   :  { %v664_v4 = vmul.f32 %v933_v3, %v661_v2  ;;  %v663_v5 = vmul.f32 %v661_v2, %v611_v37 }
 0x666   :  { %666 = vrot.lane.b32.xlu1 %v664_v4, %s979_s9 }
 0x6d8   :  { %v667_v10 = vpop.permute.xlu1 %666 }
 0x6d9   :  { %v669_v13 = vadd.f32 %v667_v10, %v663_v5 }
 0x6db   :  { %934 = vtanh.f32 %v669_v13  ;;  %v675_v15 = vsel %vm673_vm4, %v669_v13, %v611_v37  ;;  %v804_v37 = vld [vmem:[%s1447_s5 + $0x8] sm:$0xff] }
 0x6e1   :  { %v935_v20 = vpop.eup %934 }
 0x6e2   :  { %v671_v23 = vmul.f32 %v935_v20, %v662_v19 }
 0x6e4   :  { %v674_v24 = vsel %vm673_vm4, %v671_v23, %v610_v43 }
 0x6e5   :  { %878 = vmatmul.msk.f32.vlgmr.msra.gmra.mxu0 %vm181_vm2, %v674_v24  ;;  %879 = vmatmul.msk.f32.vlgmr.msra.gmra.mxu1 %vm181_vm2, %v674_v24 }
 0x762   :  { %v696_v27 = vpop.f32.mrf.mxu0  ;;  %v716_v28 = vpop.f32.mrf.mxu1 }
 0x763   :  { %v719_v31 = vadd.f32 %v696_v27, %v241_v1  ;;  %v720_v50 = vadd.f32 %v716_v28, %v282_v7 }
 0x765   :  { %936 = vtanh.f32 %v719_v31 }
 0x766   :  { %938 = vtanh.f32 %v720_v50 }
 0x76b   :  { %v937_v51 = vpop.eup %936 }
 0x76c   :  { %v723_v52 = vmul.f32 0.5, %v937_v51  ;;  %v939_v54 = vpop.eup %938 }
 0x76d   :  { %v724_v62 = vmul.f32 0.5, %v939_v54 }
 0x76e   :  { %v725_v53 = vadd.f32 0.5, %v723_v52 }
 0x76f   :  { %v726_v63 = vadd.f32 0.5, %v724_v62 }
 0x770   :  { %v728_v55 = vmul.f32 %v939_v54, %v725_v53  ;;  %v727_v56 = vmul.f32 %v725_v53, %v675_v15 }
 0x772   :  { %730 = vrot.lane.b32.xlu2 %v728_v55, %s979_s9 }
 0x7cc   :  { %v731_v59 = vpop.permute.xlu2 %730 }
 0x7cd   :  { %v733_v60 = vadd.f32 %v731_v59, %v727_v56 }
 0x7cf   :  { %940 = vtanh.f32 %v733_v60  ;;  %v739_v61 = vsel %vm737_vm5, %v733_v60, %v675_v15 }
 0x7d5   :  { %v941_v1 = vpop.eup %940 }
 0x7d6   :  { %v735_v7 = vmul.f32 %v941_v1, %v726_v63 }
 0x7d8   :  { %v738_v12 = vsel %vm737_vm5, %v735_v7, %v674_v24 }
 0x7d9   :  { %880 = vmatmul.msk.f32.vlgmr.msrb.gmra.mxu2 %vm181_vm2, %v738_v12  ;;  %881 = vmatmul.msk.f32.vlgmr.msrb.gmra.mxu3 %vm181_vm2, %v738_v12 }
 0x85c   :  { %v760_v17 = vpop.f32.mrf.mxu2  ;;  %v780_v18 = vpop.f32.mrf.mxu3 }
 0x85d   :  { %v783_v21 = vadd.f32 %v760_v17, %v1383_v9  ;;  %v784_v22 = vadd.f32 %v780_v18, %v1385_v11  ;;  %v807_v9 = vld [vmem:[%s1447_s5 + $0x20] sm:$0xff]  ;;  %v806_v11 = vld [vmem:[%s1447_s5 + $0x18] sm:$0xff] }
 0x85e   :  { %829 = vmatpush.msrb.mxu0 %v807_v9 }
 0x85f   :  { %942 = vtanh.f32 %v783_v21 }
 0x860   :  { %944 = vtanh.f32 %v784_v22  ;;  %830 = vmatpush.msrb.mxu0 %v806_v11 }
 0x862   :  { %831 = vmatpush.msrb.mxu0 %v805_v36 }
 0x864   :  { %832 = vmatpush.msrb.mxu0 %v804_v37 }
 0x865   :  { %v943_v29 = vpop.eup %942 }
 0x866   :  { %v787_v30 = vmul.f32 0.5, %v943_v29  ;;  %v945_v33 = vpop.eup %944  ;;  %833 = vmatpush.msrb.mxu0 %v803_v38 }
 0x867   :  { %v788_v42 = vmul.f32 0.5, %v945_v33 }
 0x868   :  { %v789_v32 = vadd.f32 0.5, %v787_v30 }
 0x869   :  { %v790_v43 = vadd.f32 0.5, %v788_v42 }
 0x86a   :  { %v792_v34 = vmul.f32 %v945_v33, %v789_v32  ;;  %v791_v35 = vmul.f32 %v789_v32, %v739_v61 }
 0x86c   :  { %794 = vrot.lane.b32.xlu0 %v792_v34, %s979_s9 }
 0x8de   :  { %v795_v40 = vpop.permute.xlu0 %794 }
 0x8df   :  { %v797_v41 = vadd.f32 %v795_v40, %v791_v35 }
 0x8e1   :  { %946 = vtanh.f32 %v797_v41 }
 0x8e7   :  { %v947_v44 = vpop.eup %946 }
 0x8e8   :  { %v799_v45 = vmul.f32 %v947_v44, %v790_v43 }
 0x8ea   :  { %v802_v46 = vsel %vm801_vm9, %v799_v45, %v738_v12 }
 0x8eb   :  { %882 = vmatmul.msk.f32.vlgmr.msrb.gmra.mxu0 %vm181_vm2, %v802_v46 }
 0x968   :  { %v835_v48 = vpop.f32.mrf.mxu0 }
 0x969   :  { %v836_v49 = vadd.f32 %v899_v47, %v835_v48 }
 0x96b   :  { %838 = vst [vmem:[%s1449_s7] sm:$0xff] %v836_v49 }
 0x96c   :  { %843 = vsyncpa [#allocation3], 1 }

</bundles_post_ra>
